<compile_context>
chip_gen: v7x
topology: tpu7x:2x2x1
jax: 0.10.0
libtpu: 0.0.40
codegen_flags: <defaults>
</compile_context>

<pallas_src>
import functools

import numpy as np
import jax
import jax.numpy as jnp
from jax import lax
from jax.experimental import pallas as pl
from jax.experimental.pallas import tpu as pltpu


# ----------------------------------------------------------------------------
# Host-side parameter construction (matches GaussianDiffusion.get_kernels)
# ----------------------------------------------------------------------------
def _gaussian_taps_1d(ks: int, std: float) -> np.ndarray:
    # same math as tgm.image.get_gaussian_kernel2d's 1D factor (normalized).
    coords = np.arange(ks, dtype=np.float64) - (ks - 1) / 2.0
    g = np.exp(-(coords ** 2) / (2.0 * std * std))
    return g / g.sum()


def _std_for_step(i, kernel_std, blur_routine):
    if blur_routine == "Incremental":
        return kernel_std * (i + 1)
    if blur_routine == "Constant":
        return kernel_std
    if blur_routine == "Exponential":
        return float(np.exp(kernel_std * i))
    raise NotImplementedError(blur_routine)


def make_blur_kernels(timesteps, kernel_size, kernel_std,
                      blur_routine="Incremental") -> np.ndarray:
    """Per-step 2D kernels (outer product of normalized 1D gaussians).

    Used only by the pure-JAX reference path."""
    ks = []
    for i in range(timesteps):
        g = _gaussian_taps_1d(kernel_size,
                              _std_for_step(i, kernel_std, blur_routine))
        ks.append(np.outer(g, g).astype(np.float32))
    return np.stack(ks, axis=0)  # (T, ks, ks)


def _circulant_from_taps(g: np.ndarray, n: int) -> np.ndarray:
    """Circulant matrix M so that (M @ x)[r] = sum_k g[k] * x[(r+k-half) % n],
    i.e. 1D circular cross-correlation (matches Conv2d padding_mode='circular')."""
    ksz = len(g)
    half = (ksz - 1) // 2
    m = np.zeros((n, n), np.float64)
    for r in range(n):
        for k in range(ksz):
            m[r, (r + k - half) % n] += g[k]
    return m


def make_composed_circulants(timesteps, kernel_size, kernel_std, H, W,
                             blur_routine="Incremental"):
    """Precompose the whole blur chain.

    Returns r_tab (T,H,H) and ct_tab (T,W,W) with
        blur_0..t(x)[c] == r_tab[t] @ x[c] @ ct_tab[t]
    (ct_tab[t] is already transposed)."""
    R = np.eye(H, dtype=np.float64)
    CW = np.eye(W, dtype=np.float64)
    r_list, ct_list = [], []
    for i in range(timesteps):
        g = _gaussian_taps_1d(kernel_size,
                              _std_for_step(i, kernel_std, blur_routine))
        R = _circulant_from_taps(g, H) @ R
        CW = _circulant_from_taps(g, W) @ CW
        r_list.append(R.astype(np.float32))
        ct_list.append(CW.T.astype(np.float32))
    return np.stack(r_list, 0), np.stack(ct_list, 0)


# ----------------------------------------------------------------------------
# Pallas kernel: composed blur (2 MXU matmuls / channel) + denoise + L1 partial
# ----------------------------------------------------------------------------
def _diffusion_kernel(t_ref, x_ref, r_ref, ct_ref, w_ref, b_ref,
                      recon_ref, psum_ref, *, C):
    # t_ref    : SMEM (B,)      int32 (scalar prefetch) -- only used by index_maps
    # x_ref    : VMEM (1,C,H,W) f32   -- x_start for this image
    # r_ref    : VMEM (1,H,H)   f32   -- composed row circulant R_{t[b]}
    # ct_ref   : VMEM (1,W,W)   f32   -- composed column circulant C_{t[b]}^T
    # w_ref    : SMEM (C,C)     f32   -- denoise_fn 1x1 conv weight
    # b_ref    : SMEM (C,)      f32   -- denoise_fn bias
    # recon_ref: VMEM (1,C,H,W) f32   -- x_recon output
    # psum_ref : VMEM (1,H,W)   f32   -- channel-summed |x_start - x_recon|
    del t_ref  # timestep selection already happened in the index_maps
    x0 = x_ref[0]          # (C, H, W) -- load once, reused for blur and diff
    R = r_ref[0]           # (H, H)
    CT = ct_ref[0]         # (W, W)

    # q_sample: entire 0..t blur chain collapsed into two matmuls per channel.
    xb = [jnp.dot(jnp.dot(R, x0[c], preferred_element_type=jnp.float32),
                  CT, preferred_element_type=jnp.float32)
          for c in range(C)]

    # denoise_fn (synthetic): 1x1 channel-mixing conv + bias. C is tiny (4),
    # so the unrolled VPU path beats an MXU matmul; weights are scalar SMEM
    # reads. The L1 partial stays a pure VPU accumulation (no in-kernel
    # cross-lane reduce); the final scalar reduce happens in the wrapper.
    diff = None
    for co in range(C):
        acc = xb[0] * w_ref[co, 0]
        for ci in range(1, C):
            acc = acc + w_ref[co, ci] * xb[ci]
        rec = acc + b_ref[co]
        recon_ref[0, co] = rec
        d = jnp.abs(x0[co] - rec)
        diff = d if diff is None else diff + d
    psum_ref[0] = diff


def gaussian_diffusion_forward(x, t, r_tab, ct_tab, w_dn, b_dn):
    """Fused forward: q_sample -> denoise_fn -> L1 loss (train_routine='Final')."""
    B, C, H, W = x.shape
    kernel = functools.partial(_diffusion_kernel, C=C)

    recon, psums = pl.pallas_call(
        kernel,
        out_shape=(
            jax.ShapeDtypeStruct((B, C, H, W), jnp.float32),
            jax.ShapeDtypeStruct((B, H, W), jnp.float32),
        ),
        grid_spec=pltpu.PrefetchScalarGridSpec(
            num_scalar_prefetch=1,  # t -> SMEM, available to index_maps
            grid=(B,),
            in_specs=[
                pl.BlockSpec((1, C, H, W), lambda b, t_s: (b, 0, 0, 0)),
                # data-dependent block selection: composed circulants for t[b]
                pl.BlockSpec((1, H, H), lambda b, t_s: (t_s[b], 0, 0)),
                pl.BlockSpec((1, W, W), lambda b, t_s: (t_s[b], 0, 0)),
                pl.BlockSpec(memory_space=pltpu.MemorySpace.SMEM),  # w_dn
                pl.BlockSpec(memory_space=pltpu.MemorySpace.SMEM),  # b_dn
            ],
            out_specs=[
                pl.BlockSpec((1, C, H, W), lambda b, t_s: (b, 0, 0, 0)),
                pl.BlockSpec((1, H, W), lambda b, t_s: (b, 0, 0)),
            ],
        ),
        compiler_params=pltpu.CompilerParams(
            # batch axis is fully independent -> lets v7x shard across 2 TCs
            dimension_semantics=("parallel",)),
    )(t, x, r_tab, ct_tab, w_dn, b_dn)

    # Final reduce + mean in the wrapper (negligible; keeps XLU out of the
    # kernel hot path).
    loss = jnp.sum(psums) / (B * C * H * W)
    return loss, recon


# ----------------------------------------------------------------------------
# Pure-JAX reference (independent path: wrap-pad + sequential depthwise conv)
# ----------------------------------------------------------------------------
def reference_forward(x, t, blur_kernels, w_dn, b_dn):
    B, C, H, W = x.shape
    ks = blur_kernels.shape[-1]
    half = (ks - 1) // 2

    def blur_once(img, k2d):
        xp = jnp.pad(img, ((0, 0), (0, 0), (half, half), (half, half)),
                     mode="wrap")
        w = jnp.broadcast_to(k2d[None, None], (C, 1, ks, ks))
        return lax.conv_general_dilated(
            xp, w, (1, 1), "VALID",
            dimension_numbers=("NCHW", "OIHW", "NCHW"),
            feature_group_count=C)

    cur = x
    blurs = []
    for i in range(int(jnp.max(t)) + 1):
        cur = blur_once(cur, blur_kernels[i])
        blurs.append(cur)
    all_blurs = jnp.stack(blurs)  # (max_t+1, B, C, H, W)
    x_blur = jnp.stack([all_blurs[int(t[i]), i] for i in range(B)])

    recon = jnp.einsum("oc,bchw->bohw", w_dn, x_blur) + b_dn[None, :, None, None]
    loss = jnp.mean(jnp.abs(x - recon))
    return loss, recon


if __name__ == "__main__":
    # Small, forward-consistent shapes: batch=2, channels=4, image_size=16,
    # timesteps=8, kernel_size=3, kernel_std=0.1, blur_routine='Incremental'.
    B, C, H, W = 2, 4, 16, 16
    T, KS, KSTD = 8, 3, 0.1

    key = jax.random.PRNGKey(0)
    kx, kt, kw, kb = jax.random.split(key, 4)
    x = jax.random.normal(kx, (B, C, H, W), jnp.float32)
    # forward(): t = randint(0, num_timesteps, (b,))
    t = jax.random.randint(kt, (B,), 0, T, jnp.int32)

    blur_k = jnp.asarray(make_blur_kernels(T, KS, KSTD, "Incremental"))
    r_np, ct_np = make_composed_circulants(T, KS, KSTD, H, W, "Incremental")
    r_tab = jnp.asarray(r_np)
    ct_tab = jnp.asarray(ct_np)

    w_dn = (jax.random.normal(kw, (C, C), jnp.float32) * 0.3).astype(jnp.float32)
    b_dn = (jax.random.normal(kb, (C,), jnp.float32) * 0.1).astype(jnp.float32)

    loss, recon = gaussian_diffusion_forward(x, t, r_tab, ct_tab, w_dn, b_dn)
    loss = jax.block_until_ready(loss)
    recon = jax.block_until_ready(recon)

    ref_loss, ref_recon = reference_forward(x, t, blur_k, w_dn, b_dn)
    assert np.allclose(np.asarray(loss), np.asarray(ref_loss),
                       rtol=1e-3, atol=1e-3), (loss, ref_loss)
    assert np.allclose(np.asarray(recon), np.asarray(ref_recon),
                       rtol=1e-3, atol=1e-3)

    print("KERNEL_OK")
</pallas_src>

<mosaic_0001>
module attributes {stable_mosaic.version = 11 : i64} {
  func.func @_diffusion_kernel(%arg0: i32, %arg1: memref<2xi32, #tpu.memory_space<smem>>, %arg2: memref<1x4x16x16xf32, #tpu.memory_space<vmem>>, %arg3: memref<1x16x16xf32, #tpu.memory_space<vmem>>, %arg4: memref<1x16x16xf32, #tpu.memory_space<vmem>>, %arg5: memref<4x4xf32, #tpu.memory_space<smem>>, %arg6: memref<4xf32, #tpu.memory_space<smem>>, %arg7: memref<1x4x16x16xf32, #tpu.memory_space<vmem>>, %arg8: memref<1x16x16xf32, #tpu.memory_space<vmem>>) attributes {dimension_semantics = [#tpu.dimension_semantics<parallel>], iteration_bounds = array<i64: 2>, scalar_prefetch = 1 : i64, scratch_operands = 0 : i64, tpu.core_type = #tpu.core_type<tc>, window_params = [{transform_indices = @transform_0, window_bounds = array<i64: 1, 4, 16, 16>}, {transform_indices = @transform_1, window_bounds = array<i64: 1, 16, 16>}, {transform_indices = @transform_2, window_bounds = array<i64: 1, 16, 16>}, {transform_indices = @transform_3, window_bounds = array<i64: 4, 4>}, {transform_indices = @transform_4, window_bounds = array<i64: 4>}, {transform_indices = @transform_5, window_bounds = array<i64: 1, 4, 16, 16>}, {transform_indices = @transform_6, window_bounds = array<i64: 1, 16, 16>}]} {
    %c0 = arith.constant 0 : index
    %c0_0 = arith.constant 0 : index
    %c0_1 = arith.constant 0 : index
    %c0_2 = arith.constant 0 : index
    %0 = vector.load %arg2[%c0, %c0_0, %c0_1, %c0_2] : memref<1x4x16x16xf32, #tpu.memory_space<vmem>>, vector<1x4x16x16xf32>
    %1 = vector.shape_cast %0 : vector<1x4x16x16xf32> to vector<4x16x16xf32>
    %c0_3 = arith.constant 0 : index
    %c0_4 = arith.constant 0 : index
    %c0_5 = arith.constant 0 : index
    %2 = vector.load %arg3[%c0_3, %c0_4, %c0_5] : memref<1x16x16xf32, #tpu.memory_space<vmem>>, vector<1x16x16xf32>
    %3 = vector.shape_cast %2 : vector<1x16x16xf32> to vector<16x16xf32>
    %c0_6 = arith.constant 0 : index
    %c0_7 = arith.constant 0 : index
    %c0_8 = arith.constant 0 : index
    %4 = vector.load %arg4[%c0_6, %c0_7, %c0_8] : memref<1x16x16xf32, #tpu.memory_space<vmem>>, vector<1x16x16xf32>
    %5 = vector.shape_cast %4 : vector<1x16x16xf32> to vector<16x16xf32>
    %6 = vector.extract_strided_slice %1 {offsets = [0, 0, 0], sizes = [1, 16, 16], strides = [1, 1, 1]} : vector<4x16x16xf32> to vector<1x16x16xf32>
    %7 = vector.shape_cast %6 : vector<1x16x16xf32> to vector<16x16xf32>
    %cst = arith.constant dense<0.000000e+00> : vector<16x16xf32>
    %8 = tpu.matmul %3, %7, %cst {dimension_numbers = #tpu.dot_dimension_numbers<[1], [0], [0], [1], [0, 0, 1, 1], [], []>} : vector<16x16xf32>, vector<16x16xf32>, vector<16x16xf32> -> vector<16x16xf32>
    %cst_9 = arith.constant dense<0.000000e+00> : vector<16x16xf32>
    %9 = tpu.matmul %8, %5, %cst_9 {dimension_numbers = #tpu.dot_dimension_numbers<[1], [0], [0], [1], [0, 0, 1, 1], [], []>} : vector<16x16xf32>, vector<16x16xf32>, vector<16x16xf32> -> vector<16x16xf32>
    %10 = vector.extract_strided_slice %1 {offsets = [1, 0, 0], sizes = [1, 16, 16], strides = [1, 1, 1]} : vector<4x16x16xf32> to vector<1x16x16xf32>
    %11 = vector.shape_cast %10 : vector<1x16x16xf32> to vector<16x16xf32>
    %cst_10 = arith.constant dense<0.000000e+00> : vector<16x16xf32>
    %12 = tpu.matmul %3, %11, %cst_10 {dimension_numbers = #tpu.dot_dimension_numbers<[1], [0], [0], [1], [0, 0, 1, 1], [], []>} : vector<16x16xf32>, vector<16x16xf32>, vector<16x16xf32> -> vector<16x16xf32>
    %cst_11 = arith.constant dense<0.000000e+00> : vector<16x16xf32>
    %13 = tpu.matmul %12, %5, %cst_11 {dimension_numbers = #tpu.dot_dimension_numbers<[1], [0], [0], [1], [0, 0, 1, 1], [], []>} : vector<16x16xf32>, vector<16x16xf32>, vector<16x16xf32> -> vector<16x16xf32>
    %14 = vector.extract_strided_slice %1 {offsets = [2, 0, 0], sizes = [1, 16, 16], strides = [1, 1, 1]} : vector<4x16x16xf32> to vector<1x16x16xf32>
    %15 = vector.shape_cast %14 : vector<1x16x16xf32> to vector<16x16xf32>
    %cst_12 = arith.constant dense<0.000000e+00> : vector<16x16xf32>
    %16 = tpu.matmul %3, %15, %cst_12 {dimension_numbers = #tpu.dot_dimension_numbers<[1], [0], [0], [1], [0, 0, 1, 1], [], []>} : vector<16x16xf32>, vector<16x16xf32>, vector<16x16xf32> -> vector<16x16xf32>
    %cst_13 = arith.constant dense<0.000000e+00> : vector<16x16xf32>
    %17 = tpu.matmul %16, %5, %cst_13 {dimension_numbers = #tpu.dot_dimension_numbers<[1], [0], [0], [1], [0, 0, 1, 1], [], []>} : vector<16x16xf32>, vector<16x16xf32>, vector<16x16xf32> -> vector<16x16xf32>
    %18 = vector.extract_strided_slice %1 {offsets = [3, 0, 0], sizes = [1, 16, 16], strides = [1, 1, 1]} : vector<4x16x16xf32> to vector<1x16x16xf32>
    %19 = vector.shape_cast %18 : vector<1x16x16xf32> to vector<16x16xf32>
    %cst_14 = arith.constant dense<0.000000e+00> : vector<16x16xf32>
    %20 = tpu.matmul %3, %19, %cst_14 {dimension_numbers = #tpu.dot_dimension_numbers<[1], [0], [0], [1], [0, 0, 1, 1], [], []>} : vector<16x16xf32>, vector<16x16xf32>, vector<16x16xf32> -> vector<16x16xf32>
    %cst_15 = arith.constant dense<0.000000e+00> : vector<16x16xf32>
    %21 = tpu.matmul %20, %5, %cst_15 {dimension_numbers = #tpu.dot_dimension_numbers<[1], [0], [0], [1], [0, 0, 1, 1], [], []>} : vector<16x16xf32>, vector<16x16xf32>, vector<16x16xf32> -> vector<16x16xf32>
    %c0_16 = arith.constant 0 : index
    %c0_17 = arith.constant 0 : index
    %22 = memref.load %arg5[%c0_16, %c0_17] : memref<4x4xf32, #tpu.memory_space<smem>>
    %23 = vector.broadcast %22 : f32 to vector<16x16xf32>
    %24 = arith.mulf %9, %23 : vector<16x16xf32>
    %c0_18 = arith.constant 0 : index
    %c1 = arith.constant 1 : index
    %25 = memref.load %arg5[%c0_18, %c1] : memref<4x4xf32, #tpu.memory_space<smem>>
    %26 = vector.broadcast %25 : f32 to vector<16x16xf32>
    %27 = arith.mulf %26, %13 : vector<16x16xf32>
    %28 = arith.addf %24, %27 : vector<16x16xf32>
    %c0_19 = arith.constant 0 : index
    %c2 = arith.constant 2 : index
    %29 = memref.load %arg5[%c0_19, %c2] : memref<4x4xf32, #tpu.memory_space<smem>>
    %30 = vector.broadcast %29 : f32 to vector<16x16xf32>
    %31 = arith.mulf %30, %17 : vector<16x16xf32>
    %32 = arith.addf %28, %31 : vector<16x16xf32>
    %c0_20 = arith.constant 0 : index
    %c3 = arith.constant 3 : index
    %33 = memref.load %arg5[%c0_20, %c3] : memref<4x4xf32, #tpu.memory_space<smem>>
    %34 = vector.broadcast %33 : f32 to vector<16x16xf32>
    %35 = arith.mulf %34, %21 : vector<16x16xf32>
    %36 = arith.addf %32, %35 : vector<16x16xf32>
    %c0_21 = arith.constant 0 : index
    %37 = memref.load %arg6[%c0_21] : memref<4xf32, #tpu.memory_space<smem>>
    %38 = vector.broadcast %37 : f32 to vector<16x16xf32>
    %39 = arith.addf %36, %38 : vector<16x16xf32>
    %c0_22 = arith.constant 0 : index
    %c0_23 = arith.constant 0 : index
    %c0_24 = arith.constant 0 : index
    %c0_25 = arith.constant 0 : index
    %40 = vector.load %arg7[%c0_22, %c0_23, %c0_24, %c0_25] : memref<1x4x16x16xf32, #tpu.memory_space<vmem>>, vector<1x1x16x16xf32>
    %41 = vector.shape_cast %40 : vector<1x1x16x16xf32> to vector<16x16xf32>
    %42 = vector.shape_cast %39 : vector<16x16xf32> to vector<1x1x16x16xf32>
    tpu.vector_store %arg7[%c0_22, %c0_23, %c0_24, %c0_25], %42 {strides = array<i32>} : memref<1x4x16x16xf32, #tpu.memory_space<vmem>>, vector<1x1x16x16xf32>,
    %43 = vector.extract_strided_slice %1 {offsets = [0, 0, 0], sizes = [1, 16, 16], strides = [1, 1, 1]} : vector<4x16x16xf32> to vector<1x16x16xf32>
    %44 = vector.shape_cast %43 : vector<1x16x16xf32> to vector<16x16xf32>
    %45 = arith.subf %44, %39 : vector<16x16xf32>
    %46 = math.absf %45 : vector<16x16xf32>
    %c1_26 = arith.constant 1 : index
    %c0_27 = arith.constant 0 : index
    %47 = memref.load %arg5[%c1_26, %c0_27] : memref<4x4xf32, #tpu.memory_space<smem>>
    %48 = vector.broadcast %47 : f32 to vector<16x16xf32>
    %49 = arith.mulf %9, %48 : vector<16x16xf32>
    %c1_28 = arith.constant 1 : index
    %c1_29 = arith.constant 1 : index
    %50 = memref.load %arg5[%c1_28, %c1_29] : memref<4x4xf32, #tpu.memory_space<smem>>
    %51 = vector.broadcast %50 : f32 to vector<16x16xf32>
    %52 = arith.mulf %51, %13 : vector<16x16xf32>
    %53 = arith.addf %49, %52 : vector<16x16xf32>
    %c1_30 = arith.constant 1 : index
    %c2_31 = arith.constant 2 : index
    %54 = memref.load %arg5[%c1_30, %c2_31] : memref<4x4xf32, #tpu.memory_space<smem>>
    %55 = vector.broadcast %54 : f32 to vector<16x16xf32>
    %56 = arith.mulf %55, %17 : vector<16x16xf32>
    %57 = arith.addf %53, %56 : vector<16x16xf32>
    %c1_32 = arith.constant 1 : index
    %c3_33 = arith.constant 3 : index
    %58 = memref.load %arg5[%c1_32, %c3_33] : memref<4x4xf32, #tpu.memory_space<smem>>
    %59 = vector.broadcast %58 : f32 to vector<16x16xf32>
    %60 = arith.mulf %59, %21 : vector<16x16xf32>
    %61 = arith.addf %57, %60 : vector<16x16xf32>
    %c1_34 = arith.constant 1 : index
    %62 = memref.load %arg6[%c1_34] : memref<4xf32, #tpu.memory_space<smem>>
    %63 = vector.broadcast %62 : f32 to vector<16x16xf32>
    %64 = arith.addf %61, %63 : vector<16x16xf32>
    %c0_35 = arith.constant 0 : index
    %c1_36 = arith.constant 1 : index
    %c0_37 = arith.constant 0 : index
    %c0_38 = arith.constant 0 : index
    %65 = vector.load %arg7[%c0_35, %c1_36, %c0_37, %c0_38] : memref<1x4x16x16xf32, #tpu.memory_space<vmem>>, vector<1x1x16x16xf32>
    %66 = vector.shape_cast %65 : vector<1x1x16x16xf32> to vector<16x16xf32>
    %67 = vector.shape_cast %64 : vector<16x16xf32> to vector<1x1x16x16xf32>
    tpu.vector_store %arg7[%c0_35, %c1_36, %c0_37, %c0_38], %67 {strides = array<i32>} : memref<1x4x16x16xf32, #tpu.memory_space<vmem>>, vector<1x1x16x16xf32>,
    %68 = vector.extract_strided_slice %1 {offsets = [1, 0, 0], sizes = [1, 16, 16], strides = [1, 1, 1]} : vector<4x16x16xf32> to vector<1x16x16xf32>
    %69 = vector.shape_cast %68 : vector<1x16x16xf32> to vector<16x16xf32>
    %70 = arith.subf %69, %64 : vector<16x16xf32>
    %71 = math.absf %70 : vector<16x16xf32>
    %72 = arith.addf %46, %71 : vector<16x16xf32>
    %c2_39 = arith.constant 2 : index
    %c0_40 = arith.constant 0 : index
    %73 = memref.load %arg5[%c2_39, %c0_40] : memref<4x4xf32, #tpu.memory_space<smem>>
    %74 = vector.broadcast %73 : f32 to vector<16x16xf32>
    %75 = arith.mulf %9, %74 : vector<16x16xf32>
    %c2_41 = arith.constant 2 : index
    %c1_42 = arith.constant 1 : index
    %76 = memref.load %arg5[%c2_41, %c1_42] : memref<4x4xf32, #tpu.memory_space<smem>>
    %77 = vector.broadcast %76 : f32 to vector<16x16xf32>
    %78 = arith.mulf %77, %13 : vector<16x16xf32>
    %79 = arith.addf %75, %78 : vector<16x16xf32>
    %c2_43 = arith.constant 2 : index
    %c2_44 = arith.constant 2 : index
    %80 = memref.load %arg5[%c2_43, %c2_44] : memref<4x4xf32, #tpu.memory_space<smem>>
    %81 = vector.broadcast %80 : f32 to vector<16x16xf32>
    %82 = arith.mulf %81, %17 : vector<16x16xf32>
    %83 = arith.addf %79, %82 : vector<16x16xf32>
    %c2_45 = arith.constant 2 : index
    %c3_46 = arith.constant 3 : index
    %84 = memref.load %arg5[%c2_45, %c3_46] : memref<4x4xf32, #tpu.memory_space<smem>>
    %85 = vector.broadcast %84 : f32 to vector<16x16xf32>
    %86 = arith.mulf %85, %21 : vector<16x16xf32>
    %87 = arith.addf %83, %86 : vector<16x16xf32>
    %c2_47 = arith.constant 2 : index
    %88 = memref.load %arg6[%c2_47] : memref<4xf32, #tpu.memory_space<smem>>
    %89 = vector.broadcast %88 : f32 to vector<16x16xf32>
    %90 = arith.addf %87, %89 : vector<16x16xf32>
    %c0_48 = arith.constant 0 : index
    %c2_49 = arith.constant 2 : index
    %c0_50 = arith.constant 0 : index
    %c0_51 = arith.constant 0 : index
    %91 = vector.load %arg7[%c0_48, %c2_49, %c0_50, %c0_51] : memref<1x4x16x16xf32, #tpu.memory_space<vmem>>, vector<1x1x16x16xf32>
    %92 = vector.shape_cast %91 : vector<1x1x16x16xf32> to vector<16x16xf32>
    %93 = vector.shape_cast %90 : vector<16x16xf32> to vector<1x1x16x16xf32>
    tpu.vector_store %arg7[%c0_48, %c2_49, %c0_50, %c0_51], %93 {strides = array<i32>} : memref<1x4x16x16xf32, #tpu.memory_space<vmem>>, vector<1x1x16x16xf32>,
    %94 = vector.extract_strided_slice %1 {offsets = [2, 0, 0], sizes = [1, 16, 16], strides = [1, 1, 1]} : vector<4x16x16xf32> to vector<1x16x16xf32>
    %95 = vector.shape_cast %94 : vector<1x16x16xf32> to vector<16x16xf32>
    %96 = arith.subf %95, %90 : vector<16x16xf32>
    %97 = math.absf %96 : vector<16x16xf32>
    %98 = arith.addf %72, %97 : vector<16x16xf32>
    %c3_52 = arith.constant 3 : index
    %c0_53 = arith.constant 0 : index
    %99 = memref.load %arg5[%c3_52, %c0_53] : memref<4x4xf32, #tpu.memory_space<smem>>
    %100 = vector.broadcast %99 : f32 to vector<16x16xf32>
    %101 = arith.mulf %9, %100 : vector<16x16xf32>
    %c3_54 = arith.constant 3 : index
    %c1_55 = arith.constant 1 : index
    %102 = memref.load %arg5[%c3_54, %c1_55] : memref<4x4xf32, #tpu.memory_space<smem>>
    %103 = vector.broadcast %102 : f32 to vector<16x16xf32>
    %104 = arith.mulf %103, %13 : vector<16x16xf32>
    %105 = arith.addf %101, %104 : vector<16x16xf32>
    %c3_56 = arith.constant 3 : index
    %c2_57 = arith.constant 2 : index
    %106 = memref.load %arg5[%c3_56, %c2_57] : memref<4x4xf32, #tpu.memory_space<smem>>
    %107 = vector.broadcast %106 : f32 to vector<16x16xf32>
    %108 = arith.mulf %107, %17 : vector<16x16xf32>
    %109 = arith.addf %105, %108 : vector<16x16xf32>
    %c3_58 = arith.constant 3 : index
    %c3_59 = arith.constant 3 : index
    %110 = memref.load %arg5[%c3_58, %c3_59] : memref<4x4xf32, #tpu.memory_space<smem>>
    %111 = vector.broadcast %110 : f32 to vector<16x16xf32>
    %112 = arith.mulf %111, %21 : vector<16x16xf32>
    %113 = arith.addf %109, %112 : vector<16x16xf32>
    %c3_60 = arith.constant 3 : index
    %114 = memref.load %arg6[%c3_60] : memref<4xf32, #tpu.memory_space<smem>>
    %115 = vector.broadcast %114 : f32 to vector<16x16xf32>
    %116 = arith.addf %113, %115 : vector<16x16xf32>
    %c0_61 = arith.constant 0 : index
    %c3_62 = arith.constant 3 : index
    %c0_63 = arith.constant 0 : index
    %c0_64 = arith.constant 0 : index
    %117 = vector.load %arg7[%c0_61, %c3_62, %c0_63, %c0_64] : memref<1x4x16x16xf32, #tpu.memory_space<vmem>>, vector<1x1x16x16xf32>
    %118 = vector.shape_cast %117 : vector<1x1x16x16xf32> to vector<16x16xf32>
    %119 = vector.shape_cast %116 : vector<16x16xf32> to vector<1x1x16x16xf32>
    tpu.vector_store %arg7[%c0_61, %c3_62, %c0_63, %c0_64], %119 {strides = array<i32>} : memref<1x4x16x16xf32, #tpu.memory_space<vmem>>, vector<1x1x16x16xf32>,
    %120 = vector.extract_strided_slice %1 {offsets = [3, 0, 0], sizes = [1, 16, 16], strides = [1, 1, 1]} : vector<4x16x16xf32> to vector<1x16x16xf32>
    %121 = vector.shape_cast %120 : vector<1x16x16xf32> to vector<16x16xf32>
    %122 = arith.subf %121, %116 : vector<16x16xf32>
    %123 = math.absf %122 : vector<16x16xf32>
    %124 = arith.addf %98, %123 : vector<16x16xf32>
    %c0_65 = arith.constant 0 : index
    %c0_66 = arith.constant 0 : index
    %c0_67 = arith.constant 0 : index
    %125 = vector.load %arg8[%c0_65, %c0_66, %c0_67] : memref<1x16x16xf32, #tpu.memory_space<vmem>>, vector<1x16x16xf32>
    %126 = vector.shape_cast %125 : vector<1x16x16xf32> to vector<16x16xf32>
    %127 = vector.shape_cast %124 : vector<16x16xf32> to vector<1x16x16xf32>
    tpu.vector_store %arg8[%c0_65, %c0_66, %c0_67], %127 {strides = array<i32>} : memref<1x16x16xf32, #tpu.memory_space<vmem>>, vector<1x16x16xf32>,
    return
  }
  func.func @transform_0(%arg0: i32, %arg1: memref<2xi32, #tpu.memory_space<smem>>) -> (i32, i32, i32, i32) {
    %c0_i32 = arith.constant 0 : i32
    %c0_i32_0 = arith.constant 0 : i32
    %c0_i32_1 = arith.constant 0 : i32
    %c0_i32_2 = arith.constant 0 : i32
    return %arg0, %c0_i32, %c0_i32_0, %c0_i32_1 : i32, i32, i32, i32
  }
  func.func @transform_1(%arg0: i32, %arg1: memref<2xi32, #tpu.memory_space<smem>>) -> (i32, i32, i32) {
    %0 = arith.index_cast %arg0 : i32 to index
    %1 = memref.load %arg1[%0] : memref<2xi32, #tpu.memory_space<smem>>
    %c0_i32 = arith.constant 0 : i32
    %c0_i32_0 = arith.constant 0 : i32
    %c0_i32_1 = arith.constant 0 : i32
    return %1, %c0_i32, %c0_i32_0 : i32, i32, i32
  }
  func.func @transform_2(%arg0: i32, %arg1: memref<2xi32, #tpu.memory_space<smem>>) -> (i32, i32, i32) {
    %0 = arith.index_cast %arg0 : i32 to index
    %1 = memref.load %arg1[%0] : memref<2xi32, #tpu.memory_space<smem>>
    %c0_i32 = arith.constant 0 : i32
    %c0_i32_0 = arith.constant 0 : i32
    %c0_i32_1 = arith.constant 0 : i32
    return %1, %c0_i32, %c0_i32_0 : i32, i32, i32
  }
  func.func @transform_3(%arg0: i32, %arg1: memref<2xi32, #tpu.memory_space<smem>>) -> (i32, i32) {
    %c0_i32 = arith.constant 0 : i32
    %c0_i32_0 = arith.constant 0 : i32
    %c0_i32_1 = arith.constant 0 : i32
    return %c0_i32, %c0_i32_0 : i32, i32
  }
  func.func @transform_4(%arg0: i32, %arg1: memref<2xi32, #tpu.memory_space<smem>>) -> i32 {
    %c0_i32 = arith.constant 0 : i32
    %c0_i32_0 = arith.constant 0 : i32
    return %c0_i32 : i32
  }
  func.func @transform_5(%arg0: i32, %arg1: memref<2xi32, #tpu.memory_space<smem>>) -> (i32, i32, i32, i32) {
    %c0_i32 = arith.constant 0 : i32
    %c0_i32_0 = arith.constant 0 : i32
    %c0_i32_1 = arith.constant 0 : i32
    %c0_i32_2 = arith.constant 0 : i32
    return %arg0, %c0_i32, %c0_i32_0, %c0_i32_1 : i32, i32, i32, i32
  }
  func.func @transform_6(%arg0: i32, %arg1: memref<2xi32, #tpu.memory_space<smem>>) -> (i32, i32, i32) {
    %c0_i32 = arith.constant 0 : i32
    %c0_i32_0 = arith.constant 0 : i32
    %c0_i32_1 = arith.constant 0 : i32
    return %arg0, %c0_i32, %c0_i32_0 : i32, i32, i32
  }
}

</mosaic_0001>

<bundles_post_ra>
// kernel: tpu_custom_call.1
= control target key start
LH: loop header
LB: loop body
LE: loop exit
PB: predicated region body
PF: predicated region fallthrough
CT: control target
= control target key end

     0   :  { %s2681_s0 = inlined_call_operand.hbm [shape: s32[2], index: 0, kind: input, shape index: {}]   ;;  %s2682_s1 = inlined_call_operand.hbm [shape: f32[2,4,16,16], index: 1, kind: input, shape index: {}]   ;;  %s2683_s2 = inlined_call_operand.hbm [shape: f32[8,16,16], index: 2, kind: input, shape index: {}]   ;;  %s2684_s3 = inlined_call_operand.hbm [shape: f32[8,16,16], index: 3, kind: input, shape index: {}]   ;;  %s2685_s4 = inlined_call_operand.vmem [shape: f32[4,4], index: 4, kind: input, shape index: {}]   ;;  %s2686_s5 = inlined_call_operand.vmem [shape: f32[4], index: 5, kind: input, shape index: {}]   ;;  %s2687_s6 = inlined_call_operand.hbm [shape: f32[2,4,16,16], index: 6, kind: output, shape index: {0}]   ;;  %s2688_s7 = inlined_call_operand.hbm [shape: f32[2,16,16], index: 7, kind: output, shape index: {1}]  }
   0x1   :  { %2705 = sst [smem:[#allocation36_spill]] %s2682_s1  ;;  %s1723_s26 = scalar_lea.hbm %s2681_s0, 16 }
   0x2   :  { %2706 = sst [smem:[#allocation37_spill]] %s2683_s2  ;;  %p1724_p0 = scmp.ne.s32.totalorder %s2681_s0, %s1723_s26 }
   0x3   :  { %2707 = sst [smem:[#allocation38_spill]] %s2684_s3  ;;  %p1727_p1 = scmp.lt.u32.totalorder %s1723_s26, %s2681_s0 }
   0x4   :  { %2708 = sst [smem:[#allocation39_spill]] %s2685_s4 }
   0x5   :  { %2709 = sst [smem:[#allocation40_spill]] %s2686_s5  ;;  %p1729_p2 = pnand %p1727_p1, %p1724_p0 }
   0x7   :  { %1732 = shalt.err (!%p1729_p2)  }
   0x8   :  { %s2019_s8 = smov [#allocation3]  }
   0x9   :  { %14 = dma.hbm_to_smem %s2681_s0, 16, %s2019_s8, [#allocation2] }
   0xa   :  { %1949 = dma.done.wait [#allocation2], 16 }
   0xb   :  { %1950 = vsyncadd [#allocation2], 4294967280 }
   0xc   :  { %16 = sfence }
   0xd   :  { %17 = vsyncpa [#allocation5], 0 }
   0xe   :  { %19 = vsyncpa [#allocation5 + $0x1], 0 }
   0xf   :  { %20 = vsyncpa [#allocation9], 0 }
  0x10   :  { %22 = vsyncpa [#allocation9 + $0x1], 0 }
  0x11   :  { %23 = vsyncpa [#allocation7], 0 }
  0x12   :  { %24 = vsyncpa [#allocation13], 0 }
  0x13   :  { %25 = vsyncpa [#allocation6], 0 }
  0x14   :  { %27 = vsyncpa [#allocation6 + $0x1], 0 }
  0x15   :  { %28 = vsyncpa [#allocation16], 0 }
  0x16   :  { %30 = vsyncpa [#allocation16 + $0x1], 0  ;;  %s2083_s11 = smov 0   ;;  %s2085_s12 = smov 0  }
  0x17   :  { %s2087_s13 = smov 0   ;;  %s2089_s0 = smov 0  }
  0x18   :  { %s2091_s14 = smov 0   ;;  %s2093_s15 = smov 0  }
  0x19   :  { %s2095_s16 = smov 0   ;;  %s2097_s17 = smov 0  }
  0x1a   :  { %s2099_s18 = smov 0   ;;  %s2101_s19 = smov 0  }
  0x1b LB: > { %2710 = sst [smem:[#allocation29_spill]] %s2001_s15  ;;  %s2134_s20 = sadd.s32 1, %s2017_s19   ;;  %s2017_s19 = sphi %s2101_s19, %s2769_s19   ;;  %s2013_s18 = sphi %s2099_s18, %s2768_s18   ;;  %s2009_s17 = sphi %s2097_s17, %s2761_s17   ;;  %s2005_s16 = sphi %s2095_s16, %s2760_s16   ;;  %s2001_s15 = sphi %s2093_s15, %s2759_s15   ;;  %s1997_s14 = sphi %s2091_s14, %s2767_s14   ;;  %s1993_s0 = sphi %s2089_s0, %s2766_s0   ;;  %s1989_s13 = sphi %s2087_s13, %s2765_s13   ;;  %s1985_s12 = sphi %s2085_s12, %s2764_s12   ;;  %s1981_s11 = sphi %s2083_s11, %s2763_s11  }
  0x1c   : > { %2711 = sst [smem:[#allocation30_spill]] %s2009_s17  ;;  %p2690_p3 = scmp.eq.s32.totalorder %s2017_s19, 0 }
  0x1d   : > { %2712 = sst [smem:[#allocation31_spill]] %s2013_s18  ;;  %s71_s23 = sadd.s32 1, %s2001_s15 }
  0x1e   : > { %s66_s21 = sld [smem:[#allocation3 + %s2017_s19]]  ;;  %p78_p4 = scmp.ne.s32.totalorder %s2001_s15, %s1997_s14 }
  0x1f   : > { %s67_s22 = sld [smem:[#allocation3 + %s2134_s20]]  ;;  %p84_p5 = scmp.ne.s32.totalorder %s1997_s14, %s1993_s0 }
  0x20   : > { %p80_p7 = por %p78_p4, %p2690_p3  ;;  %p2689_p8 = scmp.lt.s32.totalorder %s2017_s19, 2 }
  0x21   : > { %s273_s24 = sand.u32 1, %s2017_s19   ;;  %s275_s25 = sand.u32 1, %s2001_s15  }
  0x22   : > { %s1393_s27 = sshll.u32 %s275_s25, 4  ;;  %p2152_p10 = pnand %p2689_p8, %p80_p7 }
  0x23   : > { %s1585_s30 = scalar_select %p80_p7, [#allocation3], [#allocation17] }
  0x24   : > { %s1586_s8 = scalar_select %p80_p7, %s2017_s19, 0 }
  0x25   : > { %s68_s26 = ssub.s32 %s66_s21, %s67_s22  ;;  %s2771_s30 = smov (!%p2689_p8, %s1585_s30), [#allocation19] }
  0x26   : > { %p69_p9 = scmp.eq.s32.totalorder %s68_s26, 0  ;;  %s2773_s8 = smov (!%p2689_p8, %s1586_s8), 0 }
  0x27   : > { %s277_s9 = scalar_lea.vmem [#allocation8], %s1393_s27  ;;  %s278_s21 = sld [smem:[%s2771_s30 + %s2773_s8]] }
  0x28   : > { %s2157_s29 = scalar_select %p69_p9, %s2001_s15, %s71_s23  }
  0x29   : > { %s285_s10 = sshll.u32 %s277_s9, 4  ;;  %s2167_s22 = sadd.s32 4294967295, %s2017_s19   ;;  %s2164_s10 = int_to_ptr.vmem [resolvable:$true] %s285_s10 }
  0x2a   : > { %2714 = sst [smem:[#allocation32_spill]] %s2157_s29  ;;  %p112_p11 = scmp.ne.s32.totalorder %s1985_s12, %s1981_s11 }
  0x2b   : > { %p2691_p12 = scmp.eq.s32.totalorder %s2167_s22, 0  ;;  %s2716_s2 = sld [smem:[#allocation37_spill]] }
  0x2c   : > { %s2195_s8 = scalar_lea.sflag [#allocation9], %s273_s24  ;;  %p1735_p7 = pneg %p2152_p10 }
  0x2d   : > { %s1456_s23 = sshll.u32 %s278_s21, 8  ;;  %p2180_p2 = por %p84_p5, %p2691_p12 }
  0x2e   : > { %p2191_p4 = por %p112_p11, %p2691_p12 }
  0x2f   : > { %s2715_s25 = scalar_select %p2180_p2, 1, 0 }
  0x30   : > { %s2717_s11 = scalar_select %p2191_p4, 1, 0 }
  0x31   : > { %s2187_s30 = scalar_lea.hbm %s2716_s2, %s1456_s23  ;;  %s1738_s23 = scalar_lea.hbm %s2716_s2, 2048 }
  0x32   : > { %s1733_s0 = scalar_lea.hbm %s2187_s30, 256  ;;  %p1739_p11 = scmp.lt.u32.totalorder %s2187_s30, %s2716_s2 }
  0x33   : > { %p1734_p5 = scmp.ne.s32.totalorder %s2187_s30, %s1733_s0  ;;  %p1740_p8 = scmp.lt.u32.totalorder %s1738_s23, %s1733_s0 }
  0x34   : > { %p1742_p3 = scmp.lt.u32.totalorder %s1733_s0, %s2187_s30 }
  0x35   : > { %p1736_p9 = pnand %p1735_p7, %p1734_p5  ;;  %p1741_p13 = por %p1740_p8, %p1739_p11 }
  0x37   : > { %p1737_p6 = pneg %p1736_p9  ;;  %p1743_p12 = por %p1742_p3, %p1741_p13 }
  0x39   : > { %p1744_p0 = pnand %p1743_p12, %p1737_p6 }
  0x3b   : > { %1747 = shalt.err (!%p1744_p0)
}
  0x3c   : > { %s1748_s24 = scalar_lea.vmem %s2164_s10, 256  ;;  %s2020_s9 = smov [#allocation8]  }
  0x3d   : > { %p1749_p5 = scmp.ne.s32.totalorder %s2164_s10, %s1748_s24  ;;  %s1753_s21 = sshll.u32 %s2020_s9, 4  ;;  %s1754_s21 = int_to_ptr.vmem [resolvable:$false] %s1753_s21 }
  0x3e   : > { %s1755_s26 = scalar_lea.vmem %s1754_s21, 512  ;;  %p1756_p4 = scmp.lt.s32.totalorder %s2164_s10, %s1754_s21 }
  0x3f   : > { %p1751_p9 = pnand %p1749_p5, %p1735_p7  ;;  %p1757_p8 = scmp.lt.s32.totalorder %s1755_s26, %s1748_s24 }
  0x41   : > { %p1752_p1 = pneg %p1751_p9  ;;  %p1758_p11 = por %p1757_p8, %p1756_p4 }
  0x43   : > { %p1759_p3 = pnand %p1758_p11, %p1752_p1 }
  0x45   : > { %1762 = shalt.err (!%p1759_p3)
}
  0x46   : > { %s2695_s0 = smov 128   ;;  %s2697_s23 = smov 8  }
  0x47   : > { %1617 = dma.hbm_to_vmem [thread:$0]  (!%p2152_p10), %s2187_s30, 256, %s2164_s10, %s2195_s8, %s2695_s0, %s2695_s0, %s2697_s23  }
  0x48   : > { %p2718_p6 = scmp.lt.s32.totalorder %s2017_s19, 3  ;;  %p2719_p12 = scmp.ge.s32.totalorder %s2017_s19, 1 }
  0x49   : > { %s2721_s4 = sld [smem:[#allocation39_spill]]  ;;  %s2722_s5 = sld [smem:[#allocation40_spill]] }
  0x4a   : > { %p2230_p13 = pnand %p2719_p12, %p2718_p6  ;;  %p2723_p1 = scmp.eq.s32.totalorder %s2167_s22, 0 }
  0x4c   : > { %s2720_s27 = scalar_select %p2230_p13, 1, 0 }
  0x4d   : > { %p1602_p0 = pneg %p2230_p13 }
  0x4f   : > { %s230_s21 = sshll.u32 %s2721_s4, 4  ;;  %s241_s2 = sshll.u32 %s2722_s5, 4  ;;  %s231_s21 = int_to_ptr.vmem [resolvable:$true] %s230_s21  ;;  %s242_s2 = int_to_ptr.vmem [resolvable:$true] %s241_s2 }
  0x50   : > { %p2244_p10 = pnand %p1602_p0, %p2723_p1  ;;  %s1763_s30 = scalar_lea.vmem %s231_s21, 64 }
  0x51   : > { %p1764_p4 = scmp.ne.s32.totalorder %s231_s21, %s1763_s30  ;;  %p1771_p8 = scmp.lt.s32.totalorder %s231_s21, %s231_s21 }
  0x52   : > { %p1765_p7 = pneg %p2244_p10  ;;  %p1772_p11 = scmp.lt.s32.totalorder %s1763_s30, %s1763_s30 }
  0x54   : > { %p1766_p5 = pnand %p1765_p7, %p1764_p4  ;;  %p1773_p3 = por %p1772_p11, %p1771_p8 }
  0x56   : > { %p1767_p9 = pneg %p1766_p5 }
  0x58   : > { %p1774_p6 = pnand %p1773_p3, %p1767_p9 }
  0x5a   : > { %1777 = shalt.err (!%p1774_p6)
}
  0x5b   : > { %s2023_s24 = smov [#allocation11]   ;;  %s1778_s9 = scalar_lea.vmem %s242_s2, 16 }
  0x5c   : > { %1605 = dma.vmem_to_smem (!%p2244_p10), %s231_s21, 64, %s2023_s24, [#allocation7]  }
  0x5d   : > { %p1779_p12 = scmp.ne.s32.totalorder %s242_s2, %s1778_s9  ;;  %p1786_p2 = scmp.lt.s32.totalorder %s242_s2, %s242_s2 }
  0x5e   : > { %p1787_p13 = scmp.lt.s32.totalorder %s1778_s9, %s1778_s9 }
  0x5f   : > { %p1781_p0 = pnand %p1779_p12, %p1765_p7 }
  0x60   : > { %p1788_p4 = por %p1787_p13, %p1786_p2 }
  0x61   : > { %p1782_p1 = pneg %p1781_p0 }
  0x63   : > { %p1789_p5 = pnand %p1788_p4, %p1782_p1 }
  0x65   : > { %1792 = shalt.err (!%p1789_p5)
}
  0x66   : > { %s2024_s26 = smov [#allocation12]   ;;  %s1385_s21 = sadd.s32 4294967294, %s2017_s19  }
  0x67   : > { %1608 = dma.vmem_to_smem (!%p2244_p10), %s242_s2, 16, %s2024_s26, [#allocation13]  }
  0x68   : > { %s40_s28 = ssub.s32 %s2017_s19, %s2134_s20  ;;  %s43_s30 = sadd.s32 1, %s2013_s18 }
  0x69   : > { %p41_p2 = scmp.eq.s32.totalorder %s40_s28, 0  ;;  %p50_p13 = scmp.ne.s32.totalorder %s2013_s18, %s2009_s17 }
  0x6a   : > { %p56_p7 = scmp.ne.s32.totalorder %s2009_s17, %s2005_s16  ;;  %p184_p9 = scmp.eq.s32.totalorder %s1385_s21, 1 }
  0x6b   : > { %s2263_s10 = scalar_select %p41_p2, %s2013_s18, %s43_s30  }
  0x6c   : > { %p2726_p8 = scmp.eq.s32.totalorder %s2017_s19, 0  ;;  %p2727_p3 = scmp.eq.s32.totalorder %s2167_s22, 0 }
  0x6d   : > { %2725 = sst [smem:[#allocation33_spill]] %s2263_s10  ;;  %p2729_p12 = scmp.eq.s32.totalorder %s2167_s22, 1 }
  0x6e   : > { %p52_p11 = por %p2726_p8, %p50_p13  ;;  %p2269_p6 = por %p2727_p3, %p56_p7 }
  0x6f   : > { %p2275_p0 = por %p2729_p12, %p50_p13  ;;  %p2279_p10 = por %p184_p9, %p56_p7 }
  0x70   : > { %s252_s26 = sand.u32 1, %s2013_s18   ;;  %s1455_s21 = sshll.u32 %s2017_s19, 10 }
  0x71   : > { %s2730_s2 = scalar_select %p2275_p0, 1, 0 }
  0x72   : > { %s2731_s9 = scalar_select %p2279_p10, 1, 0 }
  0x73   : > { %s1390_s28 = sshll.u32 %s252_s26, 6  ;;  %s2733_s1 = sld [smem:[#allocation36_spill]] }
  0x74   : > { %2732 = sst [smem:[#allocation34_spill]] %s2731_s9  ;;  %s256_s4 = scalar_lea.vmem [#allocation4], %s1390_s28 }
  0x75   : > { %s263_s5 = sshll.u32 %s256_s4, 4  ;;  %p2734_p1 = scmp.lt.s32.totalorder %s2017_s19, 2  ;;  %s2296_s5 = int_to_ptr.vmem [resolvable:$true] %s263_s5 }
  0x76   : > { %s2298_s18 = scalar_lea.sflag [#allocation5], %s252_s26 }
  0x77   : > { %p2292_p4 = pnand %p2734_p1, %p52_p11 }
  0x79   : > { %s2288_s23 = scalar_lea.hbm %s2733_s1, %s1455_s21  ;;  %p1795_p2 = pneg %p2292_p4 }
  0x7a   : > { %s1793_s0 = scalar_lea.hbm %s2288_s23, 1024  ;;  %s1798_s28 = scalar_lea.hbm %s2733_s1, 2048 }
  0x7b   : > { %p1794_p5 = scmp.ne.s32.totalorder %s2288_s23, %s1793_s0  ;;  %p1799_p9 = scmp.lt.u32.totalorder %s2288_s23, %s2733_s1 }
  0x7c   : > { %p1800_p8 = scmp.lt.u32.totalorder %s1798_s28, %s1793_s0  ;;  %p1802_p3 = scmp.lt.u32.totalorder %s1793_s0, %s2288_s23 }
  0x7d   : > { %p1796_p13 = pnand %p1795_p2, %p1794_p5 }
  0x7e   : > { %p1801_p11 = por %p1800_p8, %p1799_p9 }
  0x7f   : > { %p1797_p7 = pneg %p1796_p13 }
  0x80   : > { %p1803_p12 = por %p1802_p3, %p1801_p11 }
  0x82   : > { %p1804_p1 = pnand %p1803_p12, %p1797_p7 }
  0x84   : > { %1807 = shalt.err (!%p1804_p1)
}
  0x85   : > { %s1808_s26 = scalar_lea.vmem %s2296_s5, 1024  ;;  %s2025_s4 = smov [#allocation4]  }
  0x86   : > { %p1809_p5 = scmp.ne.s32.totalorder %s2296_s5, %s1808_s26  ;;  %s1813_s21 = sshll.u32 %s2025_s4, 4  ;;  %s1814_s21 = int_to_ptr.vmem [resolvable:$false] %s1813_s21 }
  0x87   : > { %s1815_s29 = scalar_lea.vmem %s1814_s21, 2048  ;;  %p1816_p0 = scmp.lt.s32.totalorder %s2296_s5, %s1814_s21 }
  0x88   : > { %p1811_p13 = pnand %p1809_p5, %p1795_p2  ;;  %p1817_p9 = scmp.lt.s32.totalorder %s1815_s29, %s1808_s26 }
  0x8a   : > { %p1812_p10 = pneg %p1811_p13  ;;  %p1818_p8 = por %p1817_p9, %p1816_p0 }
  0x8c   : > { %p1819_p11 = pnand %p1818_p8, %p1812_p10 }
  0x8e   : > { %1822 = shalt.err (!%p1819_p11)
}
  0x8f   : > { %s2736_s0 = smov 8   ;;  %s2737_s28 = smov 128  }
  0x90   : > { %1612 = dma.hbm_to_vmem [thread:$0]  (!%p2292_p4), %s2288_s23, 1024, %s2296_s5, %s2298_s18, %s2737_s28, %s2737_s28, %s2736_s0  }
  0x91   : > { %s94_s10 = sld [smem:[#allocation3 + %s2017_s19]]  ;;  %p106_p0 = scmp.ne.s32.totalorder %s1989_s13, %s1985_s12 }
  0x92   : > { %s95_s30 = sld [smem:[#allocation3 + %s2134_s20]]  ;;  %p2738_p10 = scmp.eq.s32.totalorder %s2017_s19, 0 }
  0x93   : > { %s297_s26 = sand.u32 1, %s1989_s13   ;;  %s99_s29 = sadd.s32 1, %s1989_s13 }
  0x94   : > { %p108_p2 = por %p106_p0, %p2738_p10  ;;  %s1396_s1 = sshll.u32 %s297_s26, 4 }
  0x95   : > { %p2740_p3 = scmp.lt.s32.totalorder %s2017_s19, 2  ;;  %s299_s23 = scalar_lea.vmem [#allocation10], %s1396_s1 }
  0x96   : > { %s1588_s4 = scalar_select %p108_p2, [#allocation3], [#allocation18] }
  0x97   : > { %s1589_s15 = scalar_select %p108_p2, %s2017_s19, 0 }
  0x98   : > { %s96_s21 = ssub.s32 %s94_s10, %s95_s30  ;;  %s2775_s4 = smov (!%p2740_p3, %s1588_s4), [#allocation20] }
  0x99   : > { %p97_p7 = scmp.eq.s32.totalorder %s96_s21, 0  ;;  %p2741_p12 = pmov %p2740_p3 }
  0x9a   : > { %p2742_p1 = pmov %p2740_p3  ;;  %s307_s10 = sshll.u32 %s299_s23, 4  ;;  %s2351_s10 = int_to_ptr.vmem [resolvable:$true] %s307_s10 }
  0x9b   : > { %s2339_s9 = scalar_select %p97_p7, %s1989_s13, %s99_s29  }
  0x9c   : > { %s2777_s15 = smov (!%p2741_p12, %s1589_s15), 0  ;;  %p2347_p4 = pnand %p2742_p1, %p108_p2 }
  0x9d   : > { %2739 = sst [smem:[#allocation35_spill]] %s2339_s9 }
  0x9e   : > { %s300_s18 = sld [smem:[%s2775_s4 + %s2777_s15]]  ;;  %p1825_p13 = pneg %p2347_p4 }
  0x9f   : > { %s2744_s3 = sld [smem:[#allocation38_spill]] }
  0xa4   : > { %s1457_s30 = sshll.u32 %s300_s18, 8 }
  0xa5   : > { %s2356_s29 = scalar_lea.hbm %s2744_s3, %s1457_s30  ;;  %s1828_s4 = scalar_lea.hbm %s2744_s3, 2048 }
  0xa6   : > { %s1823_s9 = scalar_lea.hbm %s2356_s29, 256  ;;  %p1829_p11 = scmp.lt.u32.totalorder %s2356_s29, %s2744_s3 }
  0xa7   : > { %p1824_p5 = scmp.ne.s32.totalorder %s2356_s29, %s1823_s9  ;;  %p1830_p0 = scmp.lt.u32.totalorder %s1828_s4, %s1823_s9 }
  0xa8   : > { %p1832_p2 = scmp.lt.u32.totalorder %s1823_s9, %s2356_s29 }
  0xa9   : > { %p1826_p9 = pnand %p1825_p13, %p1824_p5  ;;  %p1831_p10 = por %p1830_p0, %p1829_p11 }
  0xab   : > { %p1827_p8 = pneg %p1826_p9  ;;  %p1833_p7 = por %p1832_p2, %p1831_p10 }
  0xad   : > { %p1834_p3 = pnand %p1833_p7, %p1827_p8 }
  0xaf   : > { %1837 = shalt.err (!%p1834_p3)
}
  0xb0   : > { %s1838_s30 = scalar_lea.vmem %s2351_s10, 256  ;;  %s2026_s26 = smov [#allocation10]  }
  0xb1   : > { %p1839_p12 = scmp.ne.s32.totalorder %s2351_s10, %s1838_s30  ;;  %s1843_s21 = sshll.u32 %s2026_s26, 4  ;;  %s1844_s21 = int_to_ptr.vmem [resolvable:$false] %s1843_s21 }
  0xb2   : > { %s1845_s1 = scalar_lea.vmem %s1844_s21, 512  ;;  %p1846_p9 = scmp.lt.s32.totalorder %s2351_s10, %s1844_s21 }
  0xb3   : > { %p1841_p1 = pnand %p1839_p12, %p1825_p13  ;;  %p1847_p11 = scmp.lt.s32.totalorder %s1845_s1, %s1838_s30 }
  0xb5   : > { %p1842_p5 = pneg %p1841_p1  ;;  %p1848_p0 = por %p1847_p11, %p1846_p9 }
  0xb7   : > { %p1849_p10 = pnand %p1848_p0, %p1842_p5 }
  0xb9   : > { %1852 = shalt.err (!%p1849_p10)
}
  0xba   : > { %1622 = dma.hbm_to_vmem [thread:$0]  (!%p2347_p4), %s2356_s29, 256, %s2351_s10, %s2195_s8, %s2737_s28, %s2737_s28, %s2736_s0  }
  0xbb   : > { %p2745_p13 = scmp.ne.s32.totalorder %s2720_s27, 0 }
  0xbc   : > { %s2390_s9 = sand.u32 (!%p2745_p13), 1, %s2009_s17  }
  0xbd   : > { %319 = sbr.rel (%p2745_p13) target bundleno = 710 (0x2c6), region = 40  ;;  %s2703_s15 = sshll.u32 (!%p2745_p13), %s2390_s9, 6 }
  0xbe   : > { %s322_s4 = scalar_lea.sflag (!%p2745_p13), [#allocation5], %s2390_s9  ;;  %s2396_s5 = scalar_lea.vmem (!%p2745_p13), [#allocation4], %s2703_s15 }
  0xc4   : > { %1952 = dma.done.wait (%p2269_p6), %s322_s4, 1024  }
  0xc5   : > { %1954 = vsyncadd (%p2269_p6), %s322_s4, 4294966272  ;;  %s330_s8 = sand.u32 1, %s2167_s22   ;;  %s332_s27 = sand.u32 1, %s1997_s14  }
  0xc6   : > { %s2404_s0 = sshll.u32 %s332_s27, 4  ;;  %s331_s28 = scalar_lea.sflag [#allocation9], %s330_s8 }
  0xc7   : > { %s334_s10 = scalar_lea.vmem [#allocation8], %s2404_s0  ;;  %p2746_p4 = scmp.ne.s32.totalorder %s2715_s25, 0 }
  0xc9   : > { %1956 = dma.done.wait (%p2746_p4), %s331_s28, 256  }
  0xca   : > { %1958 = vsyncadd (%p2746_p4), %s331_s28, 4294967040  ;;  %s341_s29 = sand.u32 1, %s1985_s12   ;;  %p2747_p6 = scmp.ne.s32.totalorder %s2717_s11, 0 }
  0xcb   : > { %s1402_s24 = sshll.u32 %s341_s29, 4 }
  0xcc   : > { %s343_s18 = scalar_lea.vmem [#allocation10], %s1402_s24 }
  0xcd   : > { %1960 = dma.done.wait (%p2747_p6), %s331_s28, 256  }
  0xce   : > { %1962 = vsyncadd (%p2747_p6), %s331_s28, 4294967040  ;;  %p2748_p8 = scmp.eq.s32.totalorder %s2167_s22, 0 }
  0xd0   : > { %1964 = dma.done.wait (%p2748_p8), [#allocation7], 64   ;;  %p2749_p2 = pmov %p2748_p8 }
  0xd2   : > { %1966 = vsyncadd (%p2749_p2), [#allocation7], 4294967232  ;;  %p2750_p7 = pmov %p2749_p2 }
  0xd3   : > { %p2751_p3 = pmov %p2749_p2 }
  0xd4   : > { %1968 = dma.done.wait (%p2750_p7), [#allocation13], 16  }
  0xd5   : > { %1970 = vsyncadd (%p2751_p3), [#allocation13], 4294967280 }
  0xd6   : > { %356 = sfence }
  0xd7   : > { %v2425_v0 = vld [vmem:[%s2396_s5] sm:$0xff]  ;;  %v2428_v1 = vld [vmem:[%s2396_s5 + $0x8] sm:$0xff]  ;;  %vm410_vm0 = vcmask 130048   ;;  %v2434_v4 = vld [vmem:[%s2396_s5 + $0x10] sm:$0xff]  ;;  %s2472_s25 = sld [smem:[#allocation11]]  ;;  %s2480_s26 = sld [smem:[#allocation11 + $0x1]] }
  0xd8   : > { %v406_v2 = vld [vmem:[%s334_s10] sm:$0xff]  ;;  %v1548_v3 = vpack.c.bf16 %v2428_v1, %v2425_v0  ;;  %v2437_v5 = vld [vmem:[%s2396_s5 + $0x18] sm:$0xff]  ;;  %v2445_v8 = vld [vmem:[%s2396_s5 + $0x28] sm:$0xff]  ;;  %s2474_s11 = sld [smem:[#allocation11 + $0x80]]  ;;  %s2482_s21 = sld [smem:[#allocation11 + $0x81]] }
  0xd9   : > { %1496 = vmatprep.mubr.msk.f32.mxu0 %vm410_vm0, %v406_v2  ;;  %v1556_v6 = vpack.c.bf16 %v2437_v5, %v2434_v4  ;;  %v2442_v7 = vld [vmem:[%s2396_s5 + $0x20] sm:$0xff]  ;;  %v409_v10 = vld [vmem:[%s343_s18 + $0x8] sm:$0xff]  ;;  %v2450_v14 = vld [vmem:[%s2396_s5 + $0x30] sm:$0xff]  ;;  %s2476_s23 = sld [smem:[#allocation11 + $0x100]]  ;;  %s2484_s1 = sld [smem:[#allocation11 + $0x101]] }
  0xda   : > { %1549 = vmatprep.subr.bf16.mxu0 %v1548_v3  ;;  %v408_v9 = vld [vmem:[%s343_s18] sm:$0xff]  ;;  %v407_v11 = vld [vmem:[%s334_s10 + $0x8] sm:$0xff]  ;;  %v1564_v13 = vpack.c.bf16 %v2445_v8, %v2442_v7  ;;  %s2478_s30 = sld [smem:[#allocation11 + $0x180]]  ;;  %s2486_s4 = sld [smem:[#allocation11 + $0x181]] }
  0xdb   : > { %1551 = vmatpush3.bf16.msra.mxu0 %v1548_v3  ;;  %v1552_v12 = vpack.c.bf16 %v409_v10, %v408_v9  ;;  %v2453_v15 = vld [vmem:[%s2396_s5 + $0x38] sm:$0xff]  ;;  %s2488_s5 = sld [smem:[#allocation11 + $0x2]]  ;;  %s2496_s28 = sld [smem:[#allocation11 + $0x3]] }
  0xdc   : > { %1557 = vmatprep.subr.bf16.mxu0 %v1556_v6  ;;  %v1572_v16 = vpack.c.bf16 %v2453_v15, %v2450_v14  ;;  %s2490_s8 = sld [smem:[#allocation11 + $0x82]]  ;;  %s2498_s10 = sld [smem:[#allocation11 + $0x83]] }
  0xdd   : > { %1553 = vmatprep.subr.bf16.mxu1 %v1552_v12  ;;  %s2492_s27 = sld [smem:[#allocation11 + $0x102]]  ;;  %s2500_s29 = sld [smem:[#allocation11 + $0x103]]  ;;  %v1042_v25 = vstv %s2472_s25  ;;  %v1046_v29 = vstv %s2480_s26 }
  0xde   : > { %1497 = vmatmul.mubr.msk.f32.vlgmr.msra.gmra.mrb[0].mxu0 %vm410_vm0, %v407_v11  ;;  %1555 = vmatpush3.bf16.msra.mxu1 %v1552_v12  ;;  %s2494_s0 = sld [smem:[#allocation11 + $0x182]]  ;;  %s2502_s24 = sld [smem:[#allocation11 + $0x183]]  ;;  %v1074_v26 = vstv %s2474_s11  ;;  %v1078_v30 = vstv %s2482_s21 }
  0xdf   : > { %1559 = vmatpush3.bf16.msra.mxu0 %v1556_v6  ;;  %1510 = vmatprep.mubr.msk.f32.mxu0 %vm410_vm0, %v406_v2  ;;  %s2504_s18 = sld [smem:[#allocation12]]  ;;  %s2506_s15 = sld [smem:[#allocation12 + $0x1]]  ;;  %v1109_v27 = vstv %s2476_s23  ;;  %v1113_v31 = vstv %s2484_s1 }
  0xe0   : > { %1565 = vmatprep.subr.bf16.mxu0 %v1564_v13  ;;  %1561 = vmatprep.subr.bf16.mxu1 %v1552_v12  ;;  %s2508_s3 = sld [smem:[#allocation12 + $0x2]]  ;;  %s2510_s17 = sld [smem:[#allocation12 + $0x3]]  ;;  %v1144_v28 = vstv %s2478_s30  ;;  %v1148_v32 = vstv %s2486_s4 }
  0xe1   : > { %v1052_v34 = vstv %s2488_s5  ;;  %v1058_v39 = vstv %s2496_s28  ;;  %s1458_s25 = sshll.u32 %s2167_s22, 10  ;;  %s2752_s11 = sshll.u32 %s2390_s9, 6 }
  0xe2   : > { %1511 = vmatmul.mubr.msk.f32.vlgmr.msra.gmra.mrb[2].mxu0 %vm410_vm0, %v407_v11  ;;  %v1084_v35 = vstv %s2490_s8  ;;  %v1090_v40 = vstv %s2498_s10  ;;  %s388_s23 = scalar_lea.vmem [#allocation14], %s2752_s11  ;;  %s2556_s1 = scalar_lea.hbm %s2687_s6, %s1458_s25 }
  0xe3   : > { %1567 = vmatpush3.bf16.msra.mxu0 %v1564_v13  ;;  %1524 = vmatprep.mubr.msk.f32.mxu0 %vm410_vm0, %v406_v2  ;;  %v1119_v36 = vstv %s2492_s27  ;;  %v1125_v41 = vstv %s2500_s29  ;;  %s1199_s30 = sshll.u32 %s388_s23, 4  ;;  %p2753_p1 = scmp.ne.s32.totalorder %s2730_s2, 0  ;;  %s2565_s30 = int_to_ptr.vmem [resolvable:$true] %s1199_s30 }
  0xe4   : > { %1573 = vmatprep.subr.bf16.mxu0 %v1572_v16  ;;  %v1154_v37 = vstv %s2494_s0  ;;  %v1160_v42 = vstv %s2502_s24  ;;  %s2027_s4 = smov [#allocation14]  }
  0xe5   : > { %v1064_v43 = vstv %s2504_s18  ;;  %v1096_v44 = vstv %s2506_s15  ;;  %s1853_s15 = scalar_lea.vmem %s2565_s30, 1024  ;;  %s1857_s5 = sshll.u32 %s2027_s4, 4  ;;  %s1858_s5 = int_to_ptr.vmem [resolvable:$false] %s1857_s5 }
  0xe6   : > { %1525 = vmatmul.mubr.msk.f32.vlgmr.msra.gmra.mrb[4].mxu0 %vm410_vm0, %v407_v11  ;;  %v1131_v45 = vstv %s2508_s3  ;;  %v1166_v46 = vstv %s2510_s17  ;;  %s1406_s3 = sshll.u32 %s2390_s9, 4  ;;  %s1181_s17 = scalar_lea.sflag [#allocation6], %s2390_s9 }
  0xe7   : > { %1575 = vmatpush3.bf16.msra.mxu0 %v1572_v16  ;;  %1538 = vmatprep.mubr.msk.f32.mxu0 %vm410_vm0, %v406_v2  ;;  %p1854_p12 = scmp.ne.s32.totalorder %s2565_s30, %s1853_s15  ;;  %s1859_s8 = scalar_lea.vmem %s1858_s5, 2048 }
  0xe8   : > { %p1860_p11 = scmp.lt.s32.totalorder %s2565_s30, %s1858_s5  ;;  %p1861_p0 = scmp.lt.s32.totalorder %s1859_s8, %s1853_s15 }
  0xe9   : > { %p1855_p5 = pnand %p1854_p12, %p2753_p1 }
  0xea   : > { %1539 = vmatmul.mubr.msk.f32.vlgmr.msra.gmra.mrb[6].mxu0 %vm410_vm0, %v407_v11  ;;  %p1862_p10 = por %p1861_p0, %p1860_p11 }
  0xeb   : > { %p1856_p9 = pneg %p1855_p5 }
  0xed   : > { %p1863_p13 = pnand %p1862_p10, %p1856_p9 }
 0x1b1   : > { %v1498_v17 = vpop.f32.mrb[0].mxu0 }
 0x1b2   : > { %v483_v18 = vpop.f32.mrb[1].mxu0 }
 0x1b3   : > { %1503 = vmatprep.mubr.msk.f32.mxu1 %vm410_vm0, %v483_v18 }
 0x1b4   : > { %1504 = vmatmul.mubr.msk.f32.vlgmr.msra.gmra.mrb[0].mxu1 %vm410_vm0, %v1498_v17 }
 0x1b5   : > { %v1512_v19 = vpop.f32.mrb[2].mxu0  ;;  %1563 = vmatpush3.bf16.msra.mxu1 %v1552_v12 }
 0x1b6   : > { %v639_v20 = vpop.f32.mrb[3].mxu0  ;;  %1569 = vmatprep.subr.bf16.mxu1 %v1552_v12 }
 0x1b7   : > { %1517 = vmatprep.mubr.msk.f32.mxu1 %vm410_vm0, %v639_v20 }
 0x1b8   : > { %1518 = vmatmul.mubr.msk.f32.vlgmr.msra.gmra.mrb[2].mxu1 %vm410_vm0, %v1512_v19 }
 0x1b9   : > { %v1526_v21 = vpop.f32.mrb[4].mxu0  ;;  %1571 = vmatpush3.bf16.msra.mxu1 %v1552_v12 }
 0x1ba   : > { %v795_v22 = vpop.f32.mrb[5].mxu0  ;;  %1577 = vmatprep.subr.bf16.mxu1 %v1552_v12 }
 0x1bb   : > { %1531 = vmatprep.mubr.msk.f32.mxu1 %vm410_vm0, %v795_v22 }
 0x1bc   : > { %1532 = vmatmul.mubr.msk.f32.vlgmr.msra.gmra.mrb[4].mxu1 %vm410_vm0, %v1526_v21 }
 0x1bd   : > { %v1540_v23 = vpop.f32.mrb[6].mxu0  ;;  %1579 = vmatpush3.bf16.msra.mxu1 %v1552_v12 }
 0x1be   : > { %v951_v24 = vpop.f32.mrb[7].mxu0 }
 0x1bf   : > { %1545 = vmatprep.mubr.msk.f32.mxu1 %vm410_vm0, %v951_v24 }
 0x1c0   : > { %1546 = vmatmul.mubr.msk.f32.vlgmr.msra.gmra.mrb[6].mxu1 %vm410_vm0, %v1540_v23 }
 0x287   : > { %v1505_v33 = vpop.f32.mrb[0].mxu1 }
 0x288   : > { %v564_v38 = vpop.f32.mrb[1].mxu1  ;;  %v1044_v47 = vmul.f32 %v1505_v33, %v1042_v25  ;;  %v1076_v48 = vmul.f32 %v1505_v33, %v1074_v26  ;;  %v1111_v49 = vmul.f32 %v1505_v33, %v1109_v27  ;;  %v1146_v50 = vmul.f32 %v1505_v33, %v1144_v28 }
 0x289   : > { %v1043_v51 = vmul.f32 %v1042_v25, %v564_v38  ;;  %v1075_v52 = vmul.f32 %v1074_v26, %v564_v38  ;;  %v1110_v53 = vmul.f32 %v1109_v27, %v564_v38  ;;  %v1145_v54 = vmul.f32 %v1144_v28, %v564_v38 }
 0x28b   : > { %v1519_v55 = vpop.f32.mrb[2].mxu1 }
 0x28c   : > { %v1048_v56 = vmul.f32 %v1519_v55, %v1046_v29  ;;  %v1080_v57 = vmul.f32 %v1519_v55, %v1078_v30  ;;  %v1115_v58 = vmul.f32 %v1519_v55, %v1113_v31  ;;  %v1150_v59 = vmul.f32 %v1519_v55, %v1148_v32  ;;  %v720_v60 = vpop.f32.mrb[3].mxu1 }
 0x28d   : > { %v1047_v61 = vmul.f32 %v1046_v29, %v720_v60  ;;  %v1079_v62 = vmul.f32 %v1078_v30, %v720_v60  ;;  %v1114_v63 = vmul.f32 %v1113_v31, %v720_v60  ;;  %v1149_v2 = vmul.f32 %v1148_v32, %v720_v60 }
 0x28e   : > { %v1050_v3 = vadd.f32 %v1048_v56, %v1044_v47  ;;  %v1082_v6 = vadd.f32 %v1080_v57, %v1076_v48  ;;  %v1117_v9 = vadd.f32 %v1115_v58, %v1111_v49  ;;  %v1152_v10 = vadd.f32 %v1150_v59, %v1146_v50 }
 0x28f   : > { %v1049_v11 = vadd.f32 %v1047_v61, %v1043_v51  ;;  %v1081_v12 = vadd.f32 %v1079_v62, %v1075_v52  ;;  %v1116_v13 = vadd.f32 %v1114_v63, %v1110_v53  ;;  %v1151_v16 = vadd.f32 %v1149_v2, %v1145_v54  ;;  %v1533_v17 = vpop.f32.mrb[4].mxu1 }
 0x290   : > { %v1054_v18 = vmul.f32 %v1533_v17, %v1052_v34  ;;  %v1086_v19 = vmul.f32 %v1533_v17, %v1084_v35  ;;  %v1121_v20 = vmul.f32 %v1533_v17, %v1119_v36  ;;  %v1156_v21 = vmul.f32 %v1533_v17, %v1154_v37  ;;  %v876_v22 = vpop.f32.mrb[5].mxu1 }
 0x291   : > { %v1053_v23 = vmul.f32 %v1052_v34, %v876_v22  ;;  %v1085_v24 = vmul.f32 %v1084_v35, %v876_v22  ;;  %v1120_v25 = vmul.f32 %v1119_v36, %v876_v22  ;;  %v1155_v26 = vmul.f32 %v1154_v37, %v876_v22 }
 0x292   : > { %v1056_v27 = vadd.f32 %v1054_v18, %v1050_v3  ;;  %v1088_v28 = vadd.f32 %v1086_v19, %v1082_v6  ;;  %v1123_v29 = vadd.f32 %v1121_v20, %v1117_v9  ;;  %v1158_v30 = vadd.f32 %v1156_v21, %v1152_v10 }
 0x293   : > { %v1547_v31 = vpop.f32.mrb[6].mxu1  ;;  %v1055_v32 = vadd.f32 %v1053_v23, %v1049_v11  ;;  %v1087_v33 = vadd.f32 %v1085_v24, %v1081_v12  ;;  %v1122_v38 = vadd.f32 %v1120_v25, %v1116_v13  ;;  %v1157_v47 = vadd.f32 %v1155_v26, %v1151_v16 }
 0x294   : > { %v1032_v48 = vpop.f32.mrb[7].mxu1  ;;  %v1060_v49 = vmul.f32 %v1547_v31, %v1058_v39  ;;  %v1092_v50 = vmul.f32 %v1547_v31, %v1090_v40  ;;  %v1127_v51 = vmul.f32 %v1547_v31, %v1125_v41  ;;  %v1162_v52 = vmul.f32 %v1547_v31, %v1160_v42 }
 0x295   : > { %v1059_v34 = vmul.f32 %v1058_v39, %v1032_v48  ;;  %v1091_v35 = vmul.f32 %v1090_v40, %v1032_v48  ;;  %v1126_v36 = vmul.f32 %v1125_v41, %v1032_v48  ;;  %v1161_v37 = vmul.f32 %v1160_v42, %v1032_v48 }
 0x296   : > { %v1062_v53 = vadd.f32 %v1060_v49, %v1056_v27  ;;  %v1094_v54 = vadd.f32 %v1092_v50, %v1088_v28  ;;  %v1129_v55 = vadd.f32 %v1127_v51, %v1123_v29  ;;  %v1164_v56 = vadd.f32 %v1162_v52, %v1158_v30 }
 0x297   : > { %v1061_v57 = vadd.f32 %v1059_v34, %v1055_v32  ;;  %v1093_v58 = vadd.f32 %v1091_v35, %v1087_v33  ;;  %v1128_v59 = vadd.f32 %v1126_v36, %v1122_v38  ;;  %v1163_v60 = vadd.f32 %v1161_v37, %v1157_v47 }
 0x298   : > { %v1066_v39 = vadd.f32 %v1064_v43, %v1062_v53  ;;  %v1098_v40 = vadd.f32 %v1096_v44, %v1094_v54  ;;  %v1133_v41 = vadd.f32 %v1131_v45, %v1129_v55  ;;  %v1168_v42 = vadd.f32 %v1166_v46, %v1164_v56 }
 0x299   : > { %v1065_v61 = vadd.f32 %v1064_v43, %v1061_v57  ;;  %v1097_v62 = vadd.f32 %v1096_v44, %v1093_v58  ;;  %v1132_v63 = vadd.f32 %v1131_v45, %v1128_v59  ;;  %v2551_v2 = vadd.f32 %v1166_v46, %v1163_v60 }
 0x29a   : > { %1068 = vst.msk [vmem:[%s388_s23 + $0x8] sm:$0xff] %vm410_vm0, %v1066_v39  ;;  %v1070_v3 = vsub.f32 %v2428_v1, %v1066_v39  ;;  %1432 = vst.msk [vmem:[%s388_s23 + $0x18] sm:$0xff] %vm410_vm0, %v1098_v40  ;;  %v1103_v43 = vsub.f32 %v2437_v5, %v1098_v40  ;;  %v1138_v44 = vsub.f32 %v2445_v8, %v1133_v41 }
 0x29b   : > { %1439 = vst.msk [vmem:[%s388_s23 + $0x28] sm:$0xff] %vm410_vm0, %v1133_v41  ;;  %1446 = vst.msk [vmem:[%s388_s23 + $0x38] sm:$0xff] %vm410_vm0, %v1168_v42  ;;  %v1069_v45 = vsub.f32 %v2425_v0, %v1065_v61  ;;  %v1102_v1 = vsub.f32 %v2434_v4, %v1097_v62  ;;  %v1137_v5 = vsub.f32 %v2442_v7, %v1132_v63 }
 0x29c   : > { %1067 = vst.msk [vmem:[%s388_s23] sm:$0xff] %vm410_vm0, %v1065_v61  ;;  %1431 = vst.msk [vmem:[%s388_s23 + $0x10] sm:$0xff] %vm410_vm0, %v1097_v62  ;;  %v1072_v8 = vand.u32 2147483647, %v1070_v3  ;;  %v1105_v46 = vand.u32 2147483647, %v1103_v43  ;;  %v1173_v6 = vsub.f32 %v2453_v15, %v1168_v42  ;;  %v1172_v10 = vsub.f32 %v2450_v14, %v2551_v2 }
 0x29d   : > { %1438 = vst.msk [vmem:[%s388_s23 + $0x20] sm:$0xff] %vm410_vm0, %v1132_v63  ;;  %1445 = vst.msk [vmem:[%s388_s23 + $0x30] sm:$0xff] %vm410_vm0, %v2551_v2  ;;  %v1071_v9 = vand.u32 2147483647, %v1069_v45  ;;  %v1104_v0 = vand.u32 2147483647, %v1102_v1 }
 0x29e   : > { %v1107_v11 = vadd.f32 %v1105_v46, %v1072_v8  ;;  %v1140_v12 = vand.u32 2147483647, %v1138_v44 }
 0x29f   : > { %1866 = shalt.err (!%p1863_p13)
}
 0x2a0   : > { %s1867_s27 = scalar_lea.hbm %s2556_s1, 1024  ;;  %s1871_s10 = scalar_lea.hbm %s2687_s6, 2048 }
 0x2a1   : > { %p1868_p4 = scmp.ne.s32.totalorder %s2556_s1, %s1867_s27  ;;  %p1872_p2 = scmp.lt.u32.totalorder %s2556_s1, %s2687_s6 }
 0x2a2   : > { %p1873_p7 = scmp.lt.u32.totalorder %s1871_s10, %s1867_s27  ;;  %p1875_p12 = scmp.lt.u32.totalorder %s1867_s27, %s2556_s1 }
 0x2a3   : > { %p1869_p6 = pnand %p1868_p4, %p2753_p1 }
 0x2a4   : > { %p1874_p3 = por %p1873_p7, %p1872_p2 }
 0x2a5   : > { %p1870_p8 = pneg %p1869_p6 }
 0x2a6   : > { %p1876_p5 = por %p1875_p12, %p1874_p3 }
 0x2a8   : > { %p1877_p9 = pnand %p1876_p5, %p1870_p8 }
 0x2aa   : > { %1880 = shalt.err (!%p1877_p9)
}
 0x2ab   : > { %s2028_s18 = smov 128   ;;  %s2029_s25 = smov 8   ;;  %v1106_v4 = vadd.f32 %v1104_v0, %v1071_v9  ;;  %v1139_v7 = vand.u32 2147483647, %v1137_v5  ;;  %v1142_v14 = vadd.f32 %v1140_v12, %v1107_v11  ;;  %v1175_v15 = vand.u32 2147483647, %v1173_v6 }
 0x2ac   : > { %1598 = dma.vmem_to_hbm [thread:$0]  (%p2753_p1), %s2565_s30, 1024, %s2556_s1, %s1181_s17, %s2028_s18, %s2028_s18, %s2029_s25   ;;  %v1174_v16 = vand.u32 2147483647, %v1172_v10 }
 0x2ad   : > { %s1459_s11 = sshll.u32 %s2167_s22, 8  ;;  %s395_s23 = scalar_lea.vmem [#allocation15], %s1406_s3  ;;  %v1141_v13 = vadd.f32 %v1139_v7, %v1106_v4  ;;  %v1177_v17 = vadd.f32 %v1175_v15, %v1142_v14 }
 0x2ae   : > { %s1215_s26 = sshll.u32 %s395_s23, 4  ;;  %s2612_s4 = scalar_lea.hbm %s2688_s7, %s1459_s11  ;;  %s2614_s26 = int_to_ptr.vmem [resolvable:$true] %s1215_s26 }
 0x2af   : > { %v1176_v18 = vadd.f32 %v1174_v16, %v1141_v13  ;;  %1179 = vst.msk [vmem:[%s395_s23 + $0x8] sm:$0xff] %vm410_vm0, %v1177_v17  ;;  %s1186_s22 = scalar_lea.sflag [#allocation16], %s2390_s9  ;;  %s1881_s30 = scalar_lea.vmem %s2614_s26, 256 }
 0x2b0   : > { %p1882_p11 = scmp.ne.s32.totalorder %s2614_s26, %s1881_s30  ;;  %s2030_s1 = smov [#allocation15]  }
 0x2b1   : > { %1178 = vst.msk [vmem:[%s395_s23] sm:$0xff] %vm410_vm0, %v1176_v18  ;;  %s1885_s3 = sshll.u32 %s2030_s1, 4  ;;  %s1886_s3 = int_to_ptr.vmem [resolvable:$false] %s1885_s3 }
 0x2b2   : > { %p1883_p0 = pnand %p1882_p11, %p2753_p1  ;;  %s1887_s17 = scalar_lea.vmem %s1886_s3, 512 }
 0x2b3   : > { %p1888_p13 = scmp.lt.s32.totalorder %s2614_s26, %s1886_s3  ;;  %p1889_p4 = scmp.lt.s32.totalorder %s1887_s17, %s1881_s30 }
 0x2b4   : > { %p1884_p10 = pneg %p1883_p0 }
 0x2b5   : > { %p1890_p6 = por %p1889_p4, %p1888_p13 }
 0x2b7   : > { %p1891_p8 = pnand %p1890_p6, %p1884_p10 }
 0x2b9   : > { %1894 = shalt.err (!%p1891_p8)
}
 0x2ba   : > { %s1895_s5 = scalar_lea.hbm %s2612_s4, 256  ;;  %s1899_s0 = scalar_lea.hbm %s2688_s7, 512 }
 0x2bb   : > { %p1896_p2 = scmp.ne.s32.totalorder %s2612_s4, %s1895_s5  ;;  %p1900_p12 = scmp.lt.u32.totalorder %s2612_s4, %s2688_s7 }
 0x2bc   : > { %p1901_p5 = scmp.lt.u32.totalorder %s1899_s0, %s1895_s5  ;;  %p1903_p11 = scmp.lt.u32.totalorder %s1895_s5, %s2612_s4 }
 0x2bd   : > { %p1897_p7 = pnand %p1896_p2, %p2753_p1 }
 0x2be   : > { %p1902_p9 = por %p1901_p5, %p1900_p12 }
 0x2bf   : > { %p1898_p3 = pneg %p1897_p7 }
 0x2c0   : > { %p1904_p0 = por %p1903_p11, %p1902_p9 }
 0x2c2   : > { %p1905_p10 = pnand %p1904_p0, %p1898_p3 }
 0x2c4   : > { %1908 = shalt.err (!%p1905_p10)
}
 0x2c5   : > { %1599 = dma.vmem_to_hbm [thread:$0]  (%p2753_p1), %s2614_s26, 256, %s2612_s4, %s1186_s22, %s2028_s18, %s2028_s18, %s2029_s25  }
 0x2c6 PF: > { %s2754_s29 = sld [smem:[#allocation34_spill]]  ;;  %s1230_s24 = sand.u32 1, %s2005_s16  }
 0x2c7   : > { %p2756_p4 = scmp.ge.s32.totalorder %s2017_s19, 2  ;;  %s1231_s11 = scalar_lea.sflag [#allocation6], %s1230_s24 }
 0x2cc   : > { %p2755_p13 = scmp.ne.s32.totalorder %s2754_s29, 0 }
 0x2ce   : > { %p1624_p6 = pnand %p2756_p4, %p2755_p13 }
 0x2d0   : > { %1972 = dma.done.wait (!%p1624_p6), %s1231_s11, 1024  }
 0x2d1   : > { %1974 = vsyncadd (!%p1624_p6), %s1231_s11, 4294966272  ;;  %s1240_s2 = scalar_lea.sflag [#allocation16], %s1230_s24 }
 0x2d2   : > { %1976 = dma.done.wait (!%p1624_p6), %s1240_s2, 256  }
 0x2d3   : > { %1978 = vsyncadd (!%p1624_p6), %s1240_s2, 4294967040  ;;  %s2757_s9 = sld [smem:[#allocation35_spill]]  ;;  %s2758_s18 = sld [smem:[#allocation29_spill]] }
 0x2d4   : > { %s2759_s15 = sld [smem:[#allocation32_spill]]  ;;  %s2760_s16 = sld [smem:[#allocation30_spill]] }
 0x2d5   : > { %s2761_s17 = sld [smem:[#allocation31_spill]]  ;;  %s2762_s25 = sld [smem:[#allocation33_spill]] }
 0x2d6   : > { %p33_p1 = scmp.ge.s32.totalorder %s2134_s20, 4   ;;  %s2763_s11 = smov %s1985_s12 }
 0x2d7   : > { %s2764_s12 = smov %s1989_s13  ;;  %s2766_s0 = smov %s1997_s14 }
 0x2d8   : > { %s2769_s19 = smov %s2134_s20  ;;  %35 = sbr.rel (!%p33_p1) target bundleno = 27 (0x1b), region = 138 }
 0x2d9   : > { %s2765_s13 = smov %s2757_s9  ;;  %s2767_s14 = smov %s2758_s18 }
 0x2db   : > { %s2768_s18 = smov %s2762_s25 }
 0x2df   :  { %1245 = vsyncpa [#allocation5], 1 }
 0x2e0   :  { %1247 = vsyncpa [#allocation5 + $0x1], 1 }
 0x2e1   :  { %1248 = vsyncpa [#allocation9], 1 }
 0x2e2   :  { %1250 = vsyncpa [#allocation9 + $0x1], 1 }
 0x2e3   :  { %1251 = vsyncpa [#allocation6], 1 }
 0x2e4   :  { %1253 = vsyncpa [#allocation6 + $0x1], 1 }
 0x2e5   :  { %1254 = vsyncpa [#allocation16], 1 }
 0x2e6   :  { %1256 = vsyncpa [#allocation16 + $0x1], 1 }
 0x2e7   :  { %1257 = vsyncpa [#allocation7], 1 }
 0x2e8   :  { %1259 = vsyncpa [#allocation7 + $0x1], 1 }
 0x2e9   :  { %1260 = vsyncpa [#allocation13], 1 }

</bundles_post_ra>
